<compile_context>
chip_gen: v7x
topology: tpu7x:2x2x1
jax: 0.10.0
libtpu: 0.0.40
codegen_flags: <defaults>
</compile_context>

<pallas_src>
import functools

import jax
import jax.numpy as jnp
from jax import lax
from jax.experimental import pallas as pl
from jax.experimental.pallas import tpu as pltpu


# Contract x[..., in] with weight[out, in]  ==  x @ W^T  (PyTorch Linear).
_DN = (((1,), (1,)), ((), ()))


def _layernorm_epilogue(h, gamma, beta, eps, out_dtype):
    # Two-pass (numerically safe) variance; gamma folded into the per-row
    # inverse-stddev so the affine is a single multiply-add over the tile.
    mean = jnp.mean(h, axis=-1, keepdims=True)
    centered = h - mean
    var = jnp.mean(centered * centered, axis=-1, keepdims=True)
    scale = lax.rsqrt(var + eps) * gamma
    return (centered * scale + beta).astype(out_dtype)


def _fused_kernel(x_ref, w_ref, b_ref, res_ref, g_ref, beta_ref, o_ref, *, eps):
    # Resident-weight path: one matmul per row tile, LayerNorm fused.
    h = lax.dot_general(x_ref[...], w_ref[...], _DN,
                        preferred_element_type=jnp.float32)
    res = res_ref[...]
    if res.dtype != jnp.float32:
        res = res.astype(jnp.float32)
    # TODO(synk): dropout is identity in eval mode; training-mode dropout would
    # use pltpu.prng_seed / pltpu.prng_random_bits here.
    h = h + b_ref[...] + res
    o_ref[...] = _layernorm_epilogue(h, g_ref[...], beta_ref[...], eps, o_ref.dtype)


def _ktiled_kernel(x_ref, w_ref, b_ref, res_ref, g_ref, beta_ref, o_ref,
                   acc_ref, *, eps):
    # Streamed-weight path: reduction over K slices into an f32 accumulator;
    # bias / residual / LayerNorm applied once in the final K step.
    k = pl.program_id(1)

    @pl.when(k == 0)
    def _():
        acc_ref[...] = jnp.zeros_like(acc_ref)

    acc_ref[...] += lax.dot_general(x_ref[...], w_ref[...], _DN,
                                    preferred_element_type=jnp.float32)

    @pl.when(k == pl.num_programs(1) - 1)
    def _():
        res = res_ref[...]
        if res.dtype != jnp.float32:
            res = res.astype(jnp.float32)
        h = acc_ref[...] + b_ref[...] + res
        o_ref[...] = _layernorm_epilogue(h, g_ref[...], beta_ref[...], eps,
                                         o_ref.dtype)


def _tpu_vmem_capacity_bytes():
    try:
        cap = getattr(pltpu.get_tpu_info(), "vmem_capacity_bytes", None)
        if cap:
            return int(cap)
    except Exception:
        pass
    return 64 << 20  # conservative fallback: v7x per-TensorCore VMEM


def _choose_row_tile(M, footprint, budget, row_quantum):
    cands = [t for t in (512, 256, 128, 64, 32, 16, 8)
             if t % row_quantum == 0 and t <= M and M % t == 0]
    if not cands:
        return M  # full-extent block is always legal
    # Prefer >=8 grid steps (keeps both v7x TensorCores pipelined), then >=4,
    # then >=2, taking the largest tile that fits the VMEM budget.
    for min_steps in (8, 4, 2, 1):
        for t in cands:
            if M // t >= min_steps and footprint(t) <= budget:
                return t
    return cands[-1]


def bert_self_output(hidden_states, input_tensor, weight, bias, gamma, beta, *,
                     eps=1e-12, tm=None, tk=None, compute_dtype=jnp.bfloat16,
                     alias_residual=False, input_buffering=None):
    """Fused BertSelfOutput forward.

    weight: (H, H) in PyTorch nn.Linear layout (out_features, in_features),
      consumed as-is (no wrapper-side transpose).
    compute_dtype: dtype for x / W / residual (default bf16); accumulation and
      LayerNorm stats stay f32. Pass jnp.float32 (or None = keep input dtype).
    alias_residual: reuse the residual buffer for the output; only useful when
      the caller donates input_tensor (jit donate_argnums) and dtypes match.
    input_buffering: optional pl.Buffered depth for the x / residual streams
      (sweep for HBM-bound bf16 configs); None = default double buffering.
    """
    assert hidden_states.shape == input_tensor.shape
    H = hidden_states.shape[-1]
    M = hidden_states.size // H
    out_dtype = input_tensor.dtype

    x2d = hidden_states.reshape(M, H)
    res2d = input_tensor.reshape(M, H)
    w = jnp.asarray(weight)
    if compute_dtype is not None:
        x2d = x2d.astype(compute_dtype)
        res2d = res2d.astype(compute_dtype)
        w = w.astype(compute_dtype)
    b2d = jnp.asarray(bias, jnp.float32).reshape(1, H)
    g2d = jnp.asarray(gamma, jnp.float32).reshape(1, H)
    be2d = jnp.asarray(beta, jnp.float32).reshape(1, H)

    x_bytes = jnp.dtype(x2d.dtype).itemsize
    w_bytes = jnp.dtype(w.dtype).itemsize
    res_bytes = jnp.dtype(res2d.dtype).itemsize
    out_bytes = jnp.dtype(out_dtype).itemsize

    cap = _tpu_vmem_capacity_bytes()
    budget = int(cap * 0.45)  # generation-aware working-set budget

    # bf16 packs two rows per sublane: keep row tiles multiples of 16 there.
    row_quantum = 16 if 2 in (x_bytes, res_bytes, out_bytes) else 8

    affine_bytes = 3 * 2 * H * 4
    def epilogue_scratch(t):
        return 3 * t * H * 4  # f32 h / centered / scaled temporaries

    def resident_fp(t):
        return (2 * H * H * w_bytes                      # double-buffered weight
                + 2 * t * H * (x_bytes + res_bytes + out_bytes)
                + epilogue_scratch(t) + affine_bytes)

    def ktiled_fp(t, k):
        return (2 * H * k * w_bytes                      # streamed weight slice
                + 2 * t * k * x_bytes
                + 2 * t * H * (res_bytes + out_bytes)
                + t * H * 4                              # f32 accumulator scratch
                + epilogue_scratch(t) + affine_bytes)

    # Decide resident-weight vs K-tiled (streamed weight) path.
    use_ktiled = False
    if tk is not None and 0 < tk < H:
        assert H % tk == 0 and tk % 128 == 0, "tk must divide H and be a multiple of 128"
        use_ktiled = True
    elif tk is None and H % 128 == 0 and resident_fp(row_quantum) > budget:
        use_ktiled = True
        tk = 128
        for cand in (2048, 1024, 512, 256):
            if cand < H and H % cand == 0 and ktiled_fp(row_quantum, cand) <= budget:
                tk = cand
                break

    fp = (lambda t: ktiled_fp(t, tk)) if use_ktiled else resident_fp
    if tm is None:
        tm = _choose_row_tile(M, fp, budget, row_quantum)
    assert M % tm == 0, "row tile must divide the flattened row count"

    footprint = fp(tm)
    vmem_limit = int(min(cap, max(footprint + (4 << 20), 32 << 20)))

    weight_hbm_reads = (M // tm) if use_ktiled else 1
    cost = pl.CostEstimate(
        flops=2 * M * H * H + 10 * M * H,
        transcendentals=M,  # one rsqrt per row
        bytes_accessed=(M * H * (x_bytes + res_bytes + out_bytes)
                        + weight_hbm_reads * H * H * w_bytes + 3 * H * 4),
    )

    def stream_spec(shape, index_map):
        # Optional deeper buffering for the streamed x / residual tiles.
        if input_buffering is not None and hasattr(pl, "Buffered"):
            try:
                return pl.BlockSpec(shape, index_map,
                                    pipeline_mode=pl.Buffered(int(input_buffering)))
            except TypeError:
                pass
        return pl.BlockSpec(shape, index_map)

    if not use_ktiled:
        grid = (M // tm,)
        in_specs = [
            stream_spec((tm, H), lambda i: (i, 0)),         # x tile
            pl.BlockSpec((H, H), lambda i: (0, 0)),         # weight (resident)
            pl.BlockSpec((1, H), lambda i: (0, 0)),         # bias
            stream_spec((tm, H), lambda i: (i, 0)),         # residual
            pl.BlockSpec((1, H), lambda i: (0, 0)),         # gamma
            pl.BlockSpec((1, H), lambda i: (0, 0)),         # beta
        ]
        out_spec = pl.BlockSpec((tm, H), lambda i: (i, 0))
        kernel = functools.partial(_fused_kernel, eps=eps)
        scratch = []
        dim_sems = ("parallel",)
    else:
        grid = (M // tm, H // tk)                           # reduction axis last
        in_specs = [
            stream_spec((tm, tk), lambda i, k: (i, k)),     # x K-slice
            pl.BlockSpec((H, tk), lambda i, k: (0, k)),     # weight K-slice
            pl.BlockSpec((1, H), lambda i, k: (0, 0)),      # bias
            stream_spec((tm, H), lambda i, k: (i, 0)),      # residual (const in k)
            pl.BlockSpec((1, H), lambda i, k: (0, 0)),      # gamma
            pl.BlockSpec((1, H), lambda i, k: (0, 0)),      # beta
        ]
        out_spec = pl.BlockSpec((tm, H), lambda i, k: (i, 0))
        kernel = functools.partial(_ktiled_kernel, eps=eps)
        scratch = [pltpu.VMEM((tm, H), jnp.float32)]
        dim_sems = ("parallel", "arbitrary")

    aliases = {3: 0} if (alias_residual and res2d.dtype == out_dtype) else {}

    out2d = pl.pallas_call(
        kernel,
        out_shape=jax.ShapeDtypeStruct((M, H), out_dtype),
        grid_spec=pltpu.PrefetchScalarGridSpec(
            num_scalar_prefetch=0,
            grid=grid,
            in_specs=in_specs,
            out_specs=out_spec,
            scratch_shapes=scratch,
        ),
        compiler_params=pltpu.CompilerParams(
            dimension_semantics=dim_sems,
            vmem_limit_bytes=vmem_limit),
        input_output_aliases=aliases,
        cost_estimate=cost,
    )(x2d, w, b2d, res2d, g2d, be2d)

    return out2d.reshape(input_tensor.shape)


def reference(hidden_states, input_tensor, weight, bias, gamma, beta, eps=1e-12):
    h = hidden_states @ weight.T + bias
    h = h + input_tensor
    mean = jnp.mean(h, axis=-1, keepdims=True)
    var = jnp.mean((h - mean) ** 2, axis=-1, keepdims=True)
    return (h - mean) * jax.lax.rsqrt(var + eps) * gamma + beta


if __name__ == "__main__":
    B, S, H = 2, 8, 32

    keys = jax.random.split(jax.random.PRNGKey(0), 12)

    # Deterministic synthetic parameters (nn.Linear weight is (H_out, H_in)).
    weight = jax.random.normal(keys[0], (H, H), jnp.float32) / jnp.sqrt(H)
    bias = jax.random.normal(keys[1], (H,), jnp.float32) * 0.02
    gamma = 1.0 + 0.1 * jax.random.normal(keys[2], (H,), jnp.float32)
    beta = 0.1 * jax.random.normal(keys[3], (H,), jnp.float32)
    hidden_states = jax.random.normal(keys[4], (B, S, H), jnp.float32)
    input_tensor = jax.random.normal(keys[5], (B, S, H), jnp.float32)

    ref = reference(hidden_states, input_tensor, weight, bias, gamma, beta)

    # Full-precision path (tight tolerance).
    out_f32 = bert_self_output(hidden_states, input_tensor, weight, bias, gamma,
                               beta, compute_dtype=jnp.float32)
    out_f32 = jax.block_until_ready(out_f32)
    assert out_f32.shape == (B, S, H)
    assert jnp.allclose(out_f32, ref, atol=1e-5, rtol=1e-5), "f32 mismatch vs reference"

    # Default bf16-compute path (f32 accumulation + f32 LayerNorm stats).
    out_bf16 = jax.block_until_ready(
        bert_self_output(hidden_states, input_tensor, weight, bias, gamma, beta))
    assert out_bf16.shape == (B, S, H)
    assert jnp.allclose(out_bf16, ref, atol=1e-1, rtol=1e-1), "bf16 mismatch vs reference"

    # K-tiled (streamed-weight) path, exercised at a wider hidden size.
    H2 = 256
    w2 = jax.random.normal(keys[6], (H2, H2), jnp.float32) / jnp.sqrt(H2)
    b2 = jax.random.normal(keys[7], (H2,), jnp.float32) * 0.02
    g2 = 1.0 + 0.1 * jax.random.normal(keys[8], (H2,), jnp.float32)
    be2 = 0.1 * jax.random.normal(keys[9], (H2,), jnp.float32)
    hs2 = jax.random.normal(keys[10], (B, S, H2), jnp.float32)
    it2 = jax.random.normal(keys[11], (B, S, H2), jnp.float32)
    ref2 = reference(hs2, it2, w2, b2, g2, be2)
    out_kt = jax.block_until_ready(
        bert_self_output(hs2, it2, w2, b2, g2, be2,
                         compute_dtype=jnp.float32, tk=128))
    assert jnp.allclose(out_kt, ref2, atol=1e-4, rtol=1e-4), "k-tiled mismatch vs reference"

    print("KERNEL_OK")
</pallas_src>

<mosaic_0001>
module attributes {stable_mosaic.version = 11 : i64} {
  func.func @_fused_kernel(%arg0: i32, %arg1: memref<8x32xf32, #tpu.memory_space<vmem>>, %arg2: memref<32x32xf32, #tpu.memory_space<vmem>>, %arg3: memref<1x32xf32, #tpu.memory_space<vmem>>, %arg4: memref<8x32xf32, #tpu.memory_space<vmem>>, %arg5: memref<1x32xf32, #tpu.memory_space<vmem>>, %arg6: memref<1x32xf32, #tpu.memory_space<vmem>>, %arg7: memref<8x32xf32, #tpu.memory_space<vmem>>) attributes {dimension_semantics = [#tpu.dimension_semantics<parallel>], iteration_bounds = array<i64: 2>, scalar_prefetch = 0 : i64, scratch_operands = 0 : i64, tpu.core_type = #tpu.core_type<tc>, window_params = [{transform_indices = @transform_0, window_bounds = array<i64: 8, 32>}, {pipeline_mode = #tpu.pipeline_mode<synchronous>, transform_indices = @transform_1, window_bounds = array<i64: 32, 32>}, {pipeline_mode = #tpu.pipeline_mode<synchronous>, transform_indices = @transform_2, window_bounds = array<i64: 1, 32>}, {transform_indices = @transform_3, window_bounds = array<i64: 8, 32>}, {pipeline_mode = #tpu.pipeline_mode<synchronous>, transform_indices = @transform_4, window_bounds = array<i64: 1, 32>}, {pipeline_mode = #tpu.pipeline_mode<synchronous>, transform_indices = @transform_5, window_bounds = array<i64: 1, 32>}, {transform_indices = @transform_6, window_bounds = array<i64: 8, 32>}]} {
    %c0 = arith.constant 0 : index
    %c0_0 = arith.constant 0 : index
    %0 = vector.load %arg1[%c0, %c0_0] : memref<8x32xf32, #tpu.memory_space<vmem>>, vector<8x32xf32>
    %c0_1 = arith.constant 0 : index
    %c0_2 = arith.constant 0 : index
    %1 = vector.load %arg2[%c0_1, %c0_2] : memref<32x32xf32, #tpu.memory_space<vmem>>, vector<32x32xf32>
    %cst = arith.constant dense<0.000000e+00> : vector<8x32xf32>
    %2 = tpu.matmul %0, %1, %cst {dimension_numbers = #tpu.dot_dimension_numbers<[1], [1], [0], [0], [0, 0, 1, 0], [], []>} : vector<8x32xf32>, vector<32x32xf32>, vector<8x32xf32> -> vector<8x32xf32>
    %c0_3 = arith.constant 0 : index
    %c0_4 = arith.constant 0 : index
    %3 = vector.load %arg4[%c0_3, %c0_4] : memref<8x32xf32, #tpu.memory_space<vmem>>, vector<8x32xf32>
    %c0_5 = arith.constant 0 : index
    %c0_6 = arith.constant 0 : index
    %4 = vector.load %arg3[%c0_5, %c0_6] : memref<1x32xf32, #tpu.memory_space<vmem>>, vector<1x32xf32>
    %5 = vector.broadcast %4 : vector<1x32xf32> to vector<8x32xf32>
    %6 = arith.addf %2, %5 : vector<8x32xf32>
    %7 = arith.addf %6, %3 : vector<8x32xf32>
    %c0_7 = arith.constant 0 : index
    %c0_8 = arith.constant 0 : index
    %8 = vector.load %arg5[%c0_7, %c0_8] : memref<1x32xf32, #tpu.memory_space<vmem>>, vector<1x32xf32>
    %c0_9 = arith.constant 0 : index
    %c0_10 = arith.constant 0 : index
    %9 = vector.load %arg6[%c0_9, %c0_10] : memref<1x32xf32, #tpu.memory_space<vmem>>, vector<1x32xf32>
    %cst_11 = arith.constant dense<0.000000e+00> : vector<8xf32>
    %10 = vector.multi_reduction <add>, %7, %cst_11 [1] : vector<8x32xf32> to vector<8xf32>
    %11 = vector.shape_cast %10 : vector<8xf32> to vector<8x1xf32>
    %cst_12 = arith.constant 3.200000e+01 : f32
    %12 = vector.broadcast %cst_12 : f32 to vector<8x1xf32>
    %13 = arith.divf %11, %12 : vector<8x1xf32>
    %14 = vector.broadcast %13 : vector<8x1xf32> to vector<8x32xf32>
    %15 = arith.subf %7, %14 : vector<8x32xf32>
    %16 = arith.mulf %15, %15 : vector<8x32xf32>
    %cst_13 = arith.constant dense<0.000000e+00> : vector<8xf32>
    %17 = vector.multi_reduction <add>, %16, %cst_13 [1] : vector<8x32xf32> to vector<8xf32>
    %18 = vector.shape_cast %17 : vector<8xf32> to vector<8x1xf32>
    %cst_14 = arith.constant 3.200000e+01 : f32
    %19 = vector.broadcast %cst_14 : f32 to vector<8x1xf32>
    %20 = arith.divf %18, %19 : vector<8x1xf32>
    %cst_15 = arith.constant 9.99999996E-13 : f32
    %21 = vector.broadcast %cst_15 : f32 to vector<8x1xf32>
    %22 = arith.addf %20, %21 : vector<8x1xf32>
    %23 = math.rsqrt %22 : vector<8x1xf32>
    %24 = vector.broadcast %23 : vector<8x1xf32> to vector<8x32xf32>
    %25 = vector.broadcast %8 : vector<1x32xf32> to vector<8x32xf32>
    %26 = arith.mulf %24, %25 : vector<8x32xf32>
    %27 = arith.mulf %15, %26 : vector<8x32xf32>
    %28 = vector.broadcast %9 : vector<1x32xf32> to vector<8x32xf32>
    %29 = arith.addf %27, %28 : vector<8x32xf32>
    %c0_16 = arith.constant 0 : index
    %c0_17 = arith.constant 0 : index
    %30 = vector.load %arg7[%c0_16, %c0_17] : memref<8x32xf32, #tpu.memory_space<vmem>>, vector<8x32xf32>
    tpu.vector_store %arg7[%c0_16, %c0_17], %29 {strides = array<i32>} : memref<8x32xf32, #tpu.memory_space<vmem>>, vector<8x32xf32>,
    return
  }
  func.func @transform_0(%arg0: i32) -> (i32, i32) {
    %c0_i32 = arith.constant 0 : i32
    %c0_i32_0 = arith.constant 0 : i32
    return %arg0, %c0_i32 : i32, i32
  }
  func.func @transform_1(%arg0: i32) -> (i32, i32) {
    %c0_i32 = arith.constant 0 : i32
    %c0_i32_0 = arith.constant 0 : i32
    %c0_i32_1 = arith.constant 0 : i32
    return %c0_i32, %c0_i32_0 : i32, i32
  }
  func.func @transform_2(%arg0: i32) -> (i32, i32) {
    %c0_i32 = arith.constant 0 : i32
    %c0_i32_0 = arith.constant 0 : i32
    %c0_i32_1 = arith.constant 0 : i32
    return %c0_i32, %c0_i32_0 : i32, i32
  }
  func.func @transform_3(%arg0: i32) -> (i32, i32) {
    %c0_i32 = arith.constant 0 : i32
    %c0_i32_0 = arith.constant 0 : i32
    return %arg0, %c0_i32 : i32, i32
  }
  func.func @transform_4(%arg0: i32) -> (i32, i32) {
    %c0_i32 = arith.constant 0 : i32
    %c0_i32_0 = arith.constant 0 : i32
    %c0_i32_1 = arith.constant 0 : i32
    return %c0_i32, %c0_i32_0 : i32, i32
  }
  func.func @transform_5(%arg0: i32) -> (i32, i32) {
    %c0_i32 = arith.constant 0 : i32
    %c0_i32_0 = arith.constant 0 : i32
    %c0_i32_1 = arith.constant 0 : i32
    return %c0_i32, %c0_i32_0 : i32, i32
  }
  func.func @transform_6(%arg0: i32) -> (i32, i32) {
    %c0_i32 = arith.constant 0 : i32
    %c0_i32_0 = arith.constant 0 : i32
    return %arg0, %c0_i32 : i32, i32
  }
}

</mosaic_0001>

<bundles_post_ra>
// kernel: tpu_custom_call.1
= control target key start
LH: loop header
LB: loop body
LE: loop exit
PB: predicated region body
PF: predicated region fallthrough
CT: control target
= control target key end

     0   :  { %s1148_s0 = inlined_call_operand.hbm [shape: f32[16,32], index: 0, kind: input, shape index: {}]   ;;  %s1149_s1 = inlined_call_operand.hbm [shape: f32[32,32], index: 1, kind: input, shape index: {}]   ;;  %s1150_s2 = inlined_call_operand.vmem [shape: f32[1,32], index: 2, kind: input, shape index: {}]   ;;  %s1151_s3 = inlined_call_operand.hbm [shape: f32[16,32], index: 3, kind: input, shape index: {}]   ;;  %s1152_s4 = inlined_call_operand.vmem [shape: f32[1,32], index: 4, kind: input, shape index: {}]   ;;  %s1153_s5 = inlined_call_operand.vmem [shape: f32[1,32], index: 5, kind: input, shape index: {}]   ;;  %s1154_s6 = inlined_call_operand.hbm [shape: f32[16,32], index: 6, kind: output, shape index: {}]  }
   0x1   :  { %1160 = sst [smem:[#allocation13_spill]] %s1148_s0 }
   0x2   :  { %1161 = sst [smem:[#allocation14_spill]] %s1151_s3 }
   0x3   :  { %11 = vsyncpa [#allocation3], 0 }
   0x4   :  { %13 = vsyncpa [#allocation3 + $0x1], 0 }
   0x5   :  { %14 = vsyncpa [#allocation6], 0 }
   0x6   :  { %15 = vsyncpa [#allocation4], 0 }
   0x7   :  { %17 = vsyncpa [#allocation4 + $0x1], 0  ;;  %s887_s21 = smov 0   ;;  %s889_s22 = smov 0  }
   0x8   :  { %s891_s23 = smov 0   ;;  %s893_s24 = smov 0  }
   0x9 LB: > { %s908_s25 = sadd.s32 1, %s841_s24   ;;  %s30_s26 = sadd.s32 1, %s837_s23  ;;  %s841_s24 = sphi %s893_s24, %s1181_s24   ;;  %s837_s23 = sphi %s891_s23, %s1180_s23   ;;  %s833_s22 = sphi %s889_s22, %s1179_s22   ;;  %s829_s21 = sphi %s887_s21, %s1178_s21  }
   0xa   : > { %s27_s27 = ssub.s32 %s841_s24, %s908_s25  ;;  %p37_p0 = scmp.ne.s32.totalorder %s837_s23, %s833_s22 }
   0xb   : > { %p28_p1 = scmp.eq.s32.totalorder %s27_s27, 0  ;;  %p38_p2 = scmp.eq.s32.totalorder %s841_s24, 0 }
   0xc   : > { %p636_p4 = scmp.lt.s32.totalorder %s841_s24, 2  ;;  %s225_s29 = sand.u32 1, %s841_s24  }
   0xd   : > { %s919_s28 = scalar_select %p28_p1, %s837_s23, %s30_s26  }
   0xe   : > { %p39_p5 = por %p38_p2, %p37_p0  ;;  %s227_s30 = sand.u32 1, %s837_s23  }
   0xf   : > { %s926_s7 = sshll.u32 %s227_s30, 3  ;;  %s566_s8 = sshll.u32 %s841_s24, 7 }
  0x10   : > { %s1162_s0 = sld [smem:[#allocation13_spill]]  ;;  %s229_s12 = scalar_lea.vmem [#allocation2], %s926_s7 }
  0x11   : > { %s236_s13 = sshll.u32 %s229_s12, 4  ;;  %p937_p6 = pnand %p636_p4, %p39_p5  ;;  %s941_s13 = int_to_ptr.vmem [resolvable:$true] %s236_s13 }
  0x12   : > { %s943_s15 = scalar_lea.sflag [#allocation3], %s225_s29 }
  0x13   : > { %p681_p8 = pneg %p937_p6 }
  0x16   : > { %s934_s11 = scalar_lea.hbm %s1162_s0, %s566_s8  ;;  %s684_s19 = scalar_lea.hbm %s1162_s0, 256 }
  0x17   : > { %s679_s16 = scalar_lea.hbm %s934_s11, 128  ;;  %p685_p11 = scmp.lt.u32.totalorder %s934_s11, %s1162_s0 }
  0x18   : > { %p680_p7 = scmp.ne.s32.totalorder %s934_s11, %s679_s16  ;;  %p686_p12 = scmp.lt.u32.totalorder %s684_s19, %s679_s16 }
  0x19   : > { %p688_p1 = scmp.lt.u32.totalorder %s679_s16, %s934_s11 }
  0x1a   : > { %p682_p9 = pnand %p681_p8, %p680_p7  ;;  %p687_p13 = por %p686_p12, %p685_p11 }
  0x1c   : > { %p683_p10 = pneg %p682_p9  ;;  %p689_p2 = por %p688_p1, %p687_p13 }
  0x1e   : > { %p690_p4 = pnand %p689_p2, %p683_p10 }
  0x20   : > { %693 = shalt.err (!%p690_p4)
}
  0x21   : > { %s694_s27 = scalar_lea.vmem %s941_s13, 128  ;;  %s843_s29 = smov [#allocation2]  }
  0x22   : > { %p695_p5 = scmp.ne.s32.totalorder %s941_s13, %s694_s27  ;;  %s699_s30 = sshll.u32 %s843_s29, 4  ;;  %s700_s30 = int_to_ptr.vmem [resolvable:$false] %s699_s30 }
  0x23   : > { %s701_s9 = scalar_lea.vmem %s700_s30, 256  ;;  %p702_p3 = scmp.lt.s32.totalorder %s941_s13, %s700_s30 }
  0x24   : > { %p697_p7 = pnand %p695_p5, %p681_p8  ;;  %p703_p11 = scmp.lt.s32.totalorder %s701_s9, %s694_s27 }
  0x26   : > { %p698_p9 = pneg %p697_p7  ;;  %p704_p12 = por %p703_p11, %p702_p3 }
  0x28   : > { %p705_p13 = pnand %p704_p12, %p698_p9 }
  0x2a   : > { %708 = shalt.err (!%p705_p13)
}
  0x2b   : > { %627 = dma.hbm_to_vmem [thread:$0]  (!%p937_p6), %s934_s11, 128, %s941_s13, %s943_s15  }
  0x2c   : > { %s972_s10 = sadd.s32 4294967295, %s841_s24   ;;  %s561_s12 = sadd.s32 4294967294, %s841_s24  }
  0x2d   : > { %p43_p3 = scmp.ne.s32.totalorder %s833_s22, %s829_s21  ;;  %p1155_p10 = scmp.eq.s32.totalorder %s972_s10, 0 }
  0x2e   : > { %p177_p1 = scmp.eq.s32.totalorder %s972_s10, 1  ;;  %p183_p2 = scmp.eq.s32.totalorder %s561_s12, 1 }
  0x2f   : > { %p981_p4 = por %p1155_p10, %p43_p3  ;;  %p562_p5 = scmp.ge.s32.totalorder %s841_s24, 1 }
  0x30   : > { %p989_p7 = por %p177_p1, %p37_p0  ;;  %p993_p9 = por %p183_p2, %p43_p3 }
  0x31   : > { %s1164_s16 = scalar_select %p981_p4, 1, 0 }
  0x32   : > { %s1165_s11 = scalar_select %p989_p7, 1, 0 }
  0x33   : > { %s1166_s13 = scalar_select %p993_p9, 1, 0 }
  0x34   : > { %p190_p11 = scmp.lt.s32.totalorder %s841_s24, 3  ;;  %s844_s18 = smov [#allocation5]  }
  0x35   : > { %s202_s19 = sshll.u32 %s844_s18, 4  ;;  %s1168_s3 = sld [smem:[#allocation14_spill]]  ;;  %s1012_s19 = int_to_ptr.vmem [resolvable:$true] %s202_s19 }
  0x36   : > { %p998_p12 = pnand %p562_p5, %p190_p11  ;;  %s247_s29 = scalar_lea.vmem [#allocation7], %s926_s7 }
  0x37   : > { %s254_s30 = sshll.u32 %s247_s29, 4  ;;  %s255_s30 = int_to_ptr.vmem [resolvable:$true] %s254_s30 }
  0x38   : > { %s1167_s17 = scalar_select %p998_p12, 1, 0 }
  0x39   : > { %p620_p0 = pneg %p998_p12 }
  0x3b   : > { %s1007_s27 = scalar_lea.hbm %s1168_s3, %s566_s8  ;;  %p1016_p13 = pnand %p620_p0, %p1155_p10 }
  0x3c   : > { %s709_s12 = scalar_lea.hbm %s1007_s27, 128  ;;  %s714_s20 = scalar_lea.hbm %s1168_s3, 256 }
  0x3d   : > { %s1169_s9 = scalar_select %p1016_p13, 1, 0 }
  0x3e   : > { %p710_p3 = scmp.ne.s32.totalorder %s1007_s27, %s709_s12  ;;  %p715_p5 = scmp.lt.u32.totalorder %s1007_s27, %s1168_s3 }
  0x3f   : > { %p716_p11 = scmp.lt.u32.totalorder %s714_s20, %s709_s12  ;;  %p718_p0 = scmp.lt.u32.totalorder %s709_s12, %s1007_s27 }
  0x40   : > { %p712_p1 = pnand %p710_p3, %p681_p8 }
  0x41   : > { %p717_p9 = por %p716_p11, %p715_p5 }
  0x42   : > { %p713_p2 = pneg %p712_p1 }
  0x43   : > { %p719_p10 = por %p718_p0, %p717_p9 }
  0x45   : > { %p720_p7 = pnand %p719_p10, %p713_p2 }
  0x47   : > { %723 = shalt.err (!%p720_p7)
}
  0x48   : > { %s724_s29 = scalar_lea.vmem %s255_s30, 128  ;;  %s845_s0 = smov [#allocation7]  }
  0x49   : > { %p725_p4 = scmp.ne.s32.totalorder %s255_s30, %s724_s29  ;;  %s729_s8 = sshll.u32 %s845_s0, 4  ;;  %s730_s8 = int_to_ptr.vmem [resolvable:$false] %s729_s8 }
  0x4a   : > { %s731_s18 = scalar_lea.vmem %s730_s8, 256  ;;  %p732_p12 = scmp.lt.s32.totalorder %s255_s30, %s730_s8 }
  0x4b   : > { %p727_p3 = pnand %p725_p4, %p681_p8  ;;  %p733_p13 = scmp.lt.s32.totalorder %s731_s18, %s724_s29 }
  0x4d   : > { %p728_p1 = pneg %p727_p3  ;;  %p734_p5 = por %p733_p13, %p732_p12 }
  0x4f   : > { %p735_p11 = pnand %p734_p5, %p728_p1 }
  0x51   : > { %738 = shalt.err (!%p735_p11)
}
  0x52   : > { %630 = dma.hbm_to_vmem [thread:$0]  (!%p937_p6), %s1007_s27, 128, %s255_s30, %s943_s15  }
  0x53   : > { %s739_s7 = scalar_lea.hbm %s1149_s1, 512  ;;  %p1170_p10 = scmp.ne.s32.totalorder %s1169_s9, 0 }
  0x54   : > { %p740_p8 = scmp.ne.s32.totalorder %s1149_s1, %s739_s7  ;;  %p746_p12 = scmp.lt.u32.totalorder %s739_s7, %s1149_s1 }
  0x55   : > { %p741_p4 = pneg %p1170_p10 }
  0x57   : > { %p742_p7 = pnand %p741_p4, %p740_p8 }
  0x59   : > { %p743_p9 = pneg %p742_p7 }
  0x5b   : > { %p748_p13 = pnand %p746_p12, %p743_p9 }
  0x5d   : > { %751 = shalt.err (!%p748_p13)
}
  0x5e   : > { %s752_s14 = scalar_lea.vmem %s1012_s19, 512  ;;  %p760_p3 = scmp.lt.s32.totalorder %s1012_s19, %s1012_s19 }
  0x5f   : > { %p753_p6 = scmp.ne.s32.totalorder %s1012_s19, %s752_s14  ;;  %p761_p1 = scmp.lt.s32.totalorder %s752_s14, %s752_s14 }
  0x61   : > { %p755_p2 = pnand %p753_p6, %p741_p4  ;;  %p762_p5 = por %p761_p1, %p760_p3 }
  0x63   : > { %p756_p0 = pneg %p755_p2 }
  0x65   : > { %p763_p11 = pnand %p762_p5, %p756_p0 }
  0x67   : > { %766 = shalt.err (!%p763_p11)
}
  0x68   : > { %s846_s3 = smov 128   ;;  %s847_s15 = smov 8  }
  0x69   : > { %623 = dma.hbm_to_vmem [thread:$0]  (!%p1170_p10), %s1149_s1, 512, %s1012_s19, [#allocation6], %s846_s3, %s846_s3, %s847_s15  }
  0x6a   : > { %p1171_p8 = scmp.ne.s32.totalorder %s1167_s17, 0 }
  0x6b   : > { %s265_s8 = sand.u32 (!%p1171_p8), 1, %s972_s10   ;;  %s267_s18 = sand.u32 (!%p1171_p8), 1, %s833_s22  }
  0x6c   : > { %263 = sbr.rel (%p1171_p8) target bundleno = 684 (0x2ac), region = 44  ;;  %s1067_s12 = sshll.u32 (!%p1171_p8), %s267_s18, 3 }
  0x6d   : > { %s266_s20 = scalar_lea.sflag (!%p1171_p8), [#allocation3], %s265_s8  ;;  %s269_s7 = scalar_lea.vmem (!%p1171_p8), [#allocation2], %s1067_s12 }
  0x6e   : > { %p1172_p4 = scmp.ne.s32.totalorder (!%p1171_p8), %s1164_s16, 0 }
  0x73   : > { %812 = dma.done.wait (%p1172_p4), %s266_s20, 128  }
  0x74   : > { %814 = vsyncadd (%p1172_p4), %s266_s20, 4294967168  ;;  %p1173_p10 = scmp.eq.s32.totalorder %s972_s10, 0 }
  0x76   : > { %816 = dma.done.wait (%p1173_p10), [#allocation6], 512   ;;  %p1174_p7 = pmov %p1173_p10 }
  0x77   : > { %s282_s17 = scalar_lea.vmem [#allocation7], %s1067_s12 }
  0x78   : > { %818 = vsyncadd (%p1174_p7), [#allocation6], 4294966784 }
  0x79   : > { %820 = dma.done.wait (%p1172_p4), %s266_s20, 128  }
  0x7a   : > { %822 = vsyncadd (%p1172_p4), %s266_s20, 4294967168  ;;  %v848_v0 = vmov 0.0|0.0   ;;  %vm849_vm0 = vmmov 0   ;;  %v850_v1 = vmov 0.0   ;;  %vm329_vm1 = vcmask 261120   ;;  %v317_v2 = vld [vmem:[#allocation5] sm:$0xff] }
  0x7b   : > { %602 = vmatprep.subr.bf16.mxu0 %v848_v0  ;;  %599 = vmatprep.mubr.msk.f32.mxu0 %vm849_vm0, %v850_v1  ;;  %v318_v3 = vld [vmem:[#allocation5 + $0x8] sm:$0xff]  ;;  %vm604_vm2 = vmpackc.low %vm329_vm1, %vm329_vm1  ;;  %v319_v5 = vld [vmem:[#allocation5 + $0x10] sm:$0xff]  ;;  %s583_s14 = sshll.u32 %s972_s10, 7  ;;  %s315_s3 = scalar_lea.vmem [#allocation8], %s1067_s12 }
  0x7c   : > { %v603_v4 = vpack.c.bf16 %v318_v3, %v317_v2  ;;  %v320_v6 = vld [vmem:[#allocation5 + $0x18] sm:$0xff]  ;;  %v574_v9 = vld [vmem:[%s1150_s2] ss:$0 sm:$0xff]  ;;  %v321_v11 = vld [vmem:[%s282_s17] sm:$0xff]  ;;  %s461_s15 = sshll.u32 %s315_s3, 4  ;;  %s1102_s8 = scalar_lea.hbm %s1154_s6, %s583_s14  ;;  %s1104_s15 = int_to_ptr.vmem [resolvable:$true] %s461_s15 }
  0x7d   : > { %v607_v7 = vpack.c.bf16 %v320_v6, %v319_v5  ;;  %v316_v8 = vld [vmem:[%s269_s7] sm:$0xff]  ;;  %s448_s20 = scalar_lea.sflag [#allocation4], %s267_s18  ;;  %s767_s7 = scalar_lea.vmem %s1104_s15, 128 }
  0x7e   : > { %605 = vmatpush3.bf16.xpose.msk.msra.mxu0 %vm604_vm2, %v603_v4  ;;  %v580_v24 = vld [vmem:[%s1152_s4] ss:$0 sm:$0xff]  ;;  %p768_p9 = scmp.ne.s32.totalorder %s1104_s15, %s767_s7  ;;  %p1175_p12 = scmp.ne.s32.totalorder %s1165_s11, 0 }
  0x7f   : > { %606 = vmatprep.subr.bf16.mxu0 %v848_v0  ;;  %v581_v27 = vld [vmem:[%s1153_s5] ss:$0 sm:$0xff]  ;;  %s851_s10 = smov [#allocation8]  }
  0x80   : > { %p769_p13 = pnand %p768_p9, %p1175_p12  ;;  %s771_s12 = sshll.u32 %s851_s10, 4  ;;  %s772_s12 = int_to_ptr.vmem [resolvable:$false] %s771_s12 }
  0x81   : > { %s773_s17 = scalar_lea.vmem %s772_s12, 256  ;;  %p774_p2 = scmp.lt.s32.totalorder %s1104_s15, %s772_s12 }
  0x82   : > { %p770_p6 = pneg %p769_p13  ;;  %p775_p0 = scmp.lt.s32.totalorder %s773_s17, %s767_s7 }
  0x84   : > { %p776_p3 = por %p775_p0, %p774_p2 }
  0x86   : > { %609 = vmatpush3.bf16.xpose.msk.msra.mxu0 %vm604_vm2, %v607_v7  ;;  %p777_p1 = pnand %p776_p3, %p770_p6 }
  0x8d   : > { %600 = vmatmul.mubr.msk.f32.vlgmr.msra.gmra.mrb[0].mxu0 %vm329_vm1, %v316_v8 }
 0x160   : > { %v411_v10 = vpop.f32.mrb[0].mxu0 }
 0x161   : > { %v412_v12 = vadd.f32 %v574_v9, %v411_v10  ;;  %v601_v13 = vpop.f32.mrb[1].mxu0 }
 0x163   : > { %v415_v14 = vadd.f32 %v412_v12, %v321_v11 }
 0x165   : > { %v418_v15 = vsel %vm329_vm1, %v415_v14, 0.0 }
 0x166   : > { %419 = vadd.xlane.f32.xlu0 %v418_v15 }
 0x1f3   : > { %v420_v16 = vpop.xlane.xlu0 %419 }
 0x1f4   : > { %v422_v17 = vmul.f32 0.03125, %v420_v16 }
 0x1f6   : > { %v423_v18 = vsub.f32 %v415_v14, %v422_v17 }
 0x1f8   : > { %v424_v19 = vmul.f32 %v423_v18, %v423_v18 }
 0x1fa   : > { %v425_v20 = vsel %vm329_vm1, %v424_v19, 0.0 }
 0x1fb   : > { %426 = vadd.xlane.f32.xlu0 %v425_v20 }
 0x288   : > { %v427_v21 = vpop.xlane.xlu0 %426 }
 0x289   : > { %v428_v22 = vmul.f32 0.03125, %v427_v21 }
 0x28b   : > { %v429_v23 = vadd.f32 1e-12, %v428_v22 }
 0x28d   : > { %677 = vrsqrt.f32 %v429_v23 }
 0x297   : > { %v678_v25 = vpop.eup %677 }
 0x298   : > { %v437_v26 = vmul.f32 %v678_v25, %v580_v24 }
 0x29a   : > { %v438_v28 = vmul.f32 %v437_v26, %v423_v18 }
 0x29c   : > { %v445_v29 = vadd.f32 %v581_v27, %v438_v28 }
 0x29e   : > { %446 = vst.msk [vmem:[%s315_s3] sm:$0xff] %vm329_vm1, %v445_v29 }
 0x29f   : > { %780 = shalt.err (!%p777_p1)
}
 0x2a0   : > { %s781_s18 = scalar_lea.hbm %s1102_s8, 128  ;;  %s785_s9 = scalar_lea.hbm %s1154_s6, 256 }
 0x2a1   : > { %p782_p5 = scmp.ne.s32.totalorder %s1102_s8, %s781_s18  ;;  %p786_p4 = scmp.lt.u32.totalorder %s1102_s8, %s1154_s6 }
 0x2a2   : > { %p787_p10 = scmp.lt.u32.totalorder %s785_s9, %s781_s18  ;;  %p789_p9 = scmp.lt.u32.totalorder %s781_s18, %s1102_s8 }
 0x2a3   : > { %p783_p11 = pnand %p782_p5, %p1175_p12 }
 0x2a4   : > { %p788_p7 = por %p787_p10, %p786_p4 }
 0x2a5   : > { %p784_p8 = pneg %p783_p11 }
 0x2a6   : > { %p790_p13 = por %p789_p9, %p788_p7 }
 0x2a8   : > { %p791_p6 = pnand %p790_p13, %p784_p8 }
 0x2aa   : > { %794 = shalt.err (!%p791_p6)
}
 0x2ab   : > { %618 = dma.vmem_to_hbm [thread:$0]  (%p1175_p12), %s1104_s15, 128, %s1102_s8, %s448_s20  }
 0x2ac PF: > { %s473_s29 = sand.u32 1, %s829_s21   ;;  %p1176_p2 = scmp.ne.s32.totalorder %s1166_s13, 0 }
 0x2ad   : > { %p1177_p0 = scmp.ge.s32.totalorder %s841_s24, 2  ;;  %s474_s14 = scalar_lea.sflag [#allocation4], %s473_s29 }
 0x2af   : > { %p632_p3 = pnand %p1177_p0, %p1176_p2 }
 0x2b1   : > { %824 = dma.done.wait (!%p632_p3), %s474_s14, 128  }
 0x2b2   : > { %826 = vsyncadd (!%p632_p3), %s474_s14, 4294967168  ;;  %p20_p1 = scmp.ge.s32.totalorder %s908_s25, 4   ;;  %s1178_s21 = smov %s833_s22 }
 0x2b3   : > { %s1179_s22 = smov %s837_s23  ;;  %s1180_s23 = smov %s919_s28 }
 0x2b4   : > { %s1181_s24 = smov %s908_s25  ;;  %22 = sbr.rel (!%p20_p1) target bundleno = 9 (0x9), region = 104 }
 0x2bb   :  { %479 = vsyncpa [#allocation3], 1 }
 0x2bc   :  { %481 = vsyncpa [#allocation3 + $0x1], 1 }
 0x2bd   :  { %482 = vsyncpa [#allocation6], 1 }
 0x2be   :  { %483 = vsyncpa [#allocation4], 1 }
 0x2bf   :  { %485 = vsyncpa [#allocation4 + $0x1], 1 }

</bundles_post_ra>
